<compile_context>
chip_gen: v7x
topology: tpu7x:2x2x1
jax: 0.10.0
libtpu: 0.0.40
codegen_flags: <defaults>
</compile_context>

<pallas_src>
import math

import jax
import jax.numpy as jnp
from jax.experimental import pallas as pl
from jax.experimental.pallas import tpu as pltpu


# ---------------------------------------------------------------------------
# In-kernel weight composition (VPU, f32 for v5e safety; MXU consumes the cast)
# ---------------------------------------------------------------------------
def _compose_eval(wmu_ref):
    # Evaluation: W^T tile is just mu^T.
    return wmu_ref[...]


def _compose_train_dense(wmu_ref, wsig_ref, weps_ref):
    # Training (general): W^T = mu^T + sigma^T * eps^T, per element.  Matches
    # the PyTorch forward exactly (handles trained sigma / arbitrary epsilon).
    f32 = jnp.float32
    return (wmu_ref[...].astype(f32)
            + wsig_ref[...].astype(f32) * weps_ref[...].astype(f32))


def _compose_train_factorized(wmu_ref, sig_ein_ref, eout_ref):
    # Training (rank-1 fast path): constant sigma already folded into the
    # eps_in column on the host -> VPU outer product, no dense sigma/epsilon
    # HBM streams (~3x less weight traffic than the dense training path).
    f32 = jnp.float32
    return (wmu_ref[...].astype(f32)
            + sig_ein_ref[...].astype(f32) * eout_ref[...].astype(f32))


# ---------------------------------------------------------------------------
# Kernel factories
# ---------------------------------------------------------------------------
def _make_single_k_kernel(compose_w, dot_dtype):
    """Whole reduction dim fits one tile: no accumulator, no pl.when."""
    def kernel(x_ref, *refs):
        *w_refs, b_ref, o_ref = refs
        w = compose_w(*w_refs).astype(dot_dtype)
        acc = jnp.dot(x_ref[...].astype(dot_dtype), w,
                      preferred_element_type=jnp.float32)
        o_ref[...] = (acc + b_ref[...]).astype(o_ref.dtype)
    return kernel


def _make_multi_k_kernel(compose_w, dot_dtype):
    """Reduction dim split over grid axis 2 (innermost, "arbitrary")."""
    def kernel(x_ref, *refs):
        *w_refs, b_ref, o_ref, acc_ref = refs
        k = pl.program_id(2)

        @pl.when(k == 0)
        def _():
            acc_ref[...] = jnp.zeros_like(acc_ref)

        w = compose_w(*w_refs).astype(dot_dtype)
        acc_ref[...] += jnp.dot(x_ref[...].astype(dot_dtype), w,
                                preferred_element_type=jnp.float32)

        @pl.when(k == pl.num_programs(2) - 1)
        def _():
            o_ref[...] = (acc_ref[...] + b_ref[...]).astype(o_ref.dtype)
    return kernel


# ---------------------------------------------------------------------------
# Wrapper helpers
# ---------------------------------------------------------------------------
def _round_up(x, m):
    return ((x + m - 1) // m) * m


def _pick_tile(dim, max_tile, unit):
    """Largest tile <= max(max_tile, unit) that is a multiple of `unit` and
    evenly divides the unit-padded dim.  Returns (tile, padded_dim)."""
    dim_p = _round_up(max(dim, 1), unit)
    cap = min(_round_up(max(max_tile, 1), unit), dim_p)
    tile = unit
    for cand in range(cap, unit - 1, -unit):
        if dim_p % cand == 0:
            tile = cand
            break
    return tile, dim_p


def _pad2(a, rows, cols):
    r, c = a.shape
    if r == rows and c == cols:
        return a
    return jnp.pad(a, ((0, rows - r), (0, cols - c)))


# ---------------------------------------------------------------------------
# Forward pass
# ---------------------------------------------------------------------------
def noisy_linear_forward(x, params, training=True, *,
                         factorized_noise=False,
                         weight_dtype=jnp.bfloat16,
                         max_tm=256, max_tn=2048, max_tk=4096,
                         vmem_budget_bytes=24 * 1024 * 1024):
    """NoisyLinear forward.

    x:      (B, in_features) float32
    params: dict with weight_mu (O,I), weight_sigma (O,I), weight_epsilon (O,I),
            bias_mu (O,), bias_sigma (O,), bias_epsilon (O,) and (for the
            factorized fast path) weight_eps_in (I,), weight_eps_out (O,).

    training=True  : W = weight_mu + weight_sigma * weight_epsilon
    training=False : W = weight_mu
    """
    B, I = x.shape
    O = params["weight_mu"].shape[0]

    weight_dtype = jnp.dtype(weight_dtype)
    w_bytes = weight_dtype.itemsize
    x_bytes = x.dtype.itemsize
    # Number of dense (tk, tn) weight streams flowing through VMEM.
    n_w = 3 if (training and not factorized_noise) else 1

    # --- tile selection: as big as the VMEM budget allows ---
    tm, B_p = _pick_tile(B, max_tm, 8)
    tn, O_p = _pick_tile(O, max_tn, 128)
    tk, I_p = _pick_tile(I, max_tk, 128)

    def _vmem_est(tm_, tk_, tn_):
        b = 2 * n_w * tk_ * tn_ * w_bytes          # double-buffered weight streams
        b += 2 * tm_ * tk_ * x_bytes               # x tiles
        b += 2 * tm_ * tn_ * x_bytes               # output tiles
        b += 2 * tn_ * 4                           # bias row
        if training and factorized_noise:
            b += 2 * (tk_ + tn_) * 4               # eps_in column / eps_out row
        if (I_p // tk_) > 1:
            b += tm_ * tn_ * 4                     # f32 accumulator scratch
        return b

    while _vmem_est(tm, tk, tn) > vmem_budget_bytes:
        if tk >= tn and tk > 128:
            tk, I_p = _pick_tile(I, tk // 2, 128)
        elif tn > 128:
            tn, O_p = _pick_tile(O, tn // 2, 128)
        elif tm > 8:
            tm, B_p = _pick_tile(B, tm // 2, 8)
        else:
            break

    # --- host-side operand prep (layout plumbing, not compute hoisting) ---
    x_p = _pad2(x, B_p, I_p)
    # Pre-transposed (I, O) weight: MXU-direct, lane-dense on O, no in-kernel .T
    wmu_t = _pad2(params["weight_mu"].T, I_p, O_p).astype(weight_dtype)

    if training:
        bias = params["bias_mu"] + params["bias_sigma"] * params["bias_epsilon"]
    else:
        bias = params["bias_mu"]
    b_row = _pad2(bias.astype(jnp.float32).reshape(1, O), 1, O_p)

    # --- grid / specs ---
    n_i, n_j, n_k = B_p // tm, O_p // tn, I_p // tk
    multi_k = n_k > 1

    if multi_k:
        grid = (n_i, n_j, n_k)
        x_spec = pl.BlockSpec((tm, tk), lambda i, j, k: (i, k))
        w_spec = pl.BlockSpec((tk, tn), lambda i, j, k: (k, j))
        col_spec = pl.BlockSpec((tk, 1), lambda i, j, k: (k, 0))
        row_spec = pl.BlockSpec((1, tn), lambda i, j, k: (0, j))
        out_spec = pl.BlockSpec((tm, tn), lambda i, j, k: (i, j))
        scratch = [pltpu.VMEM((tm, tn), jnp.float32)]
        dims = ("parallel", "parallel", "arbitrary")
    else:
        grid = (n_i, n_j)
        x_spec = pl.BlockSpec((tm, tk), lambda i, j: (i, 0))
        w_spec = pl.BlockSpec((tk, tn), lambda i, j: (0, j))
        col_spec = pl.BlockSpec((tk, 1), lambda i, j: (0, 0))
        row_spec = pl.BlockSpec((1, tn), lambda i, j: (0, j))
        out_spec = pl.BlockSpec((tm, tn), lambda i, j: (i, j))
        scratch = []
        dims = ("parallel", "parallel")

    if not training:
        compose = _compose_eval
        operands = [x_p, wmu_t, b_row]
        in_specs = [x_spec, w_spec, row_spec]
    elif not factorized_noise:
        # Default (fully general) path: dense per-element sigma and epsilon.
        wsig_t = _pad2(params["weight_sigma"].T, I_p, O_p).astype(weight_dtype)
        weps_t = _pad2(params["weight_epsilon"].T, I_p, O_p).astype(weight_dtype)
        compose = _compose_train_dense
        operands = [x_p, wmu_t, wsig_t, weps_t, b_row]
        in_specs = [x_spec, w_spec, w_spec, w_spec, row_spec]
    else:
        # Rank-1 fast path.
        # TODO(synk): only valid while weight_sigma is the constant fill from
        # _reset_parameters() and weight_epsilon the reset_noise() outer
        # product; use the default dense path once sigma has been trained.
        sig0 = params["weight_sigma"].reshape(-1)[0]
        sig_ein = _pad2((sig0 * params["weight_eps_in"]).astype(jnp.float32)
                        .reshape(I, 1), I_p, 1)
        eout = _pad2(params["weight_eps_out"].astype(jnp.float32).reshape(1, O),
                     1, O_p)
        compose = _compose_train_factorized
        operands = [x_p, wmu_t, sig_ein, eout, b_row]
        in_specs = [x_spec, w_spec, col_spec, row_spec, row_spec]

    kernel = (_make_multi_k_kernel if multi_k else _make_single_k_kernel)(
        compose, weight_dtype)

    cost = pl.CostEstimate(
        flops=2 * B_p * I_p * O_p,
        transcendentals=0,
        bytes_accessed=int(B_p * I_p * x_bytes * n_j          # x re-read per O-tile
                           + n_w * I_p * O_p * w_bytes * n_i  # weights re-read per B-tile
                           + B_p * O_p * x_bytes              # output
                           + O_p * 4 * n_i))                  # bias row

    out_p = pl.pallas_call(
        kernel,
        out_shape=jax.ShapeDtypeStruct((B_p, O_p), x.dtype),
        grid=grid,
        in_specs=in_specs,
        out_specs=out_spec,
        scratch_shapes=scratch,
        compiler_params=pltpu.CompilerParams(
            dimension_semantics=dims,
            vmem_limit_bytes=40 * 1024 * 1024),
        cost_estimate=cost,
    )(*operands)

    return out_p[:B, :O]


# ---------------------------------------------------------------------------
# Deterministic parameter init (mirrors NoisyLinear.__init__ / reset_noise)
# ---------------------------------------------------------------------------
def _orthogonal(key, out_features, in_features, dtype=jnp.float32):
    rows, cols = out_features, in_features
    flat = jax.random.normal(key, (max(rows, cols), min(rows, cols)), dtype)
    q, r = jnp.linalg.qr(flat)
    q = q * jnp.sign(jnp.diagonal(r))
    if rows < cols:
        q = q.T
    return q[:rows, :cols].astype(dtype)


def _transform_noise(x):
    # f(x) = sign(x) * sqrt(|x|)
    return jnp.sign(x) * jnp.sqrt(jnp.abs(x))


def make_noisy_linear_params(key, in_features, out_features, std_init=0.4,
                             noisy_layer_std=0.1):
    k_w, k_in, k_ow, k_ob = jax.random.split(key, 4)
    weight_mu = _orthogonal(k_w, out_features, in_features)
    bias_mu = jnp.zeros((out_features,), jnp.float32)
    weight_sigma = jnp.full((out_features, in_features),
                            std_init / math.sqrt(in_features), jnp.float32)
    bias_sigma = jnp.full((out_features,),
                          std_init / math.sqrt(out_features), jnp.float32)

    # reset_noise(): factorized Gaussian noise
    noise_in = noisy_layer_std * jax.random.normal(k_in, (in_features,), jnp.float32)
    noise_out_w = noisy_layer_std * jax.random.normal(k_ow, (out_features,), jnp.float32)
    noise_out_b = noisy_layer_std * jax.random.normal(k_ob, (out_features,), jnp.float32)
    eps_in = _transform_noise(noise_in)          # (I,)
    eps_out = _transform_noise(noise_out_w)      # (O,)
    weight_epsilon = jnp.outer(eps_out, eps_in)  # dense buffer (as in the module)
    bias_epsilon = _transform_noise(noise_out_b)

    return {
        "weight_mu": weight_mu,
        "weight_sigma": weight_sigma,
        "weight_epsilon": weight_epsilon,
        "weight_eps_in": eps_in,
        "weight_eps_out": eps_out,
        "bias_mu": bias_mu,
        "bias_sigma": bias_sigma,
        "bias_epsilon": bias_epsilon,
    }


# ---------------------------------------------------------------------------
# Main
# ---------------------------------------------------------------------------
if __name__ == "__main__":
    key = jax.random.PRNGKey(0)
    kx1, kp1, kx2, kp2, kx3, kp3 = jax.random.split(key, 6)

    def ref(x, p, training):
        if training:
            w = p["weight_mu"] + p["weight_sigma"] * p["weight_epsilon"]
            b = p["bias_mu"] + p["bias_sigma"] * p["bias_epsilon"]
        else:
            w, b = p["weight_mu"], p["bias_mu"]
        return x @ w.T + b

    def check(y, y_ref, tol):
        assert y.shape == y_ref.shape
        assert bool(jnp.allclose(y, y_ref, atol=tol, rtol=tol)), \
            float(jnp.max(jnp.abs(y - y_ref)))

    results = []

    # Case 1: aligned small shape -> single-K fast path (no accumulator).
    B1, I1, O1 = 8, 128, 128
    x1 = jax.random.normal(kx1, (B1, I1), jnp.float32)
    p1 = make_noisy_linear_params(kp1, I1, O1)
    y1_tr = noisy_linear_forward(x1, p1, training=True)                   # dense, bf16 weights
    y1_ev = noisy_linear_forward(x1, p1, training=False)
    y1_fa = noisy_linear_forward(x1, p1, training=True, factorized_noise=True)
    y1_f32 = noisy_linear_forward(x1, p1, training=True, weight_dtype=jnp.float32)
    results += [y1_tr, y1_ev, y1_fa, y1_f32]

    # Case 2: ragged shape -> exercises zero-padding / output slicing.
    B2, I2, O2 = 5, 96, 80
    x2 = jax.random.normal(kx2, (B2, I2), jnp.float32)
    p2 = make_noisy_linear_params(kp2, I2, O2)
    y2_tr = noisy_linear_forward(x2, p2, training=True)
    y2_ev = noisy_linear_forward(x2, p2, training=False)
    results += [y2_tr, y2_ev]

    # Case 3: force multiple K tiles -> exercises accumulator + pl.when path.
    B3, I3, O3 = 8, 256, 128
    x3 = jax.random.normal(kx3, (B3, I3), jnp.float32)
    p3 = make_noisy_linear_params(kp3, I3, O3)
    y3_tr = noisy_linear_forward(x3, p3, training=True, max_tk=128)
    y3_ev = noisy_linear_forward(x3, p3, training=False, max_tk=128)
    results += [y3_tr, y3_ev]

    jax.block_until_ready(results)

    # bf16 weight streaming -> looser tolerance; f32 path -> tight.
    check(y1_tr, ref(x1, p1, True), 2e-2)
    check(y1_ev, ref(x1, p1, False), 2e-2)
    check(y1_fa, ref(x1, p1, True), 2e-2)
    check(y1_f32, ref(x1, p1, True), 5e-3)
    check(y2_tr, ref(x2, p2, True), 2e-2)
    check(y2_ev, ref(x2, p2, False), 2e-2)
    check(y3_tr, ref(x3, p3, True), 2e-2)
    check(y3_ev, ref(x3, p3, False), 2e-2)

    print("KERNEL_OK")
</pallas_src>

<mosaic_0001>
module attributes {stable_mosaic.version = 11 : i64} {
  func.func @kernel(%arg0: i32, %arg1: i32, %arg2: memref<8x128xf32, #tpu.memory_space<vmem>>, %arg3: memref<128x128xbf16, #tpu.memory_space<vmem>>, %arg4: memref<128x128xbf16, #tpu.memory_space<vmem>>, %arg5: memref<128x128xbf16, #tpu.memory_space<vmem>>, %arg6: memref<1x128xf32, #tpu.memory_space<vmem>>, %arg7: memref<8x128xf32, #tpu.memory_space<vmem>>) attributes {dimension_semantics = [#tpu.dimension_semantics<parallel>, #tpu.dimension_semantics<parallel>], iteration_bounds = array<i64: 1, 1>, scalar_prefetch = 0 : i64, scratch_operands = 0 : i64, tpu.core_type = #tpu.core_type<tc>, window_params = [{transform_indices = @transform_0, window_bounds = array<i64: 8, 128>}, {transform_indices = @transform_1, window_bounds = array<i64: 128, 128>}, {transform_indices = @transform_2, window_bounds = array<i64: 128, 128>}, {transform_indices = @transform_3, window_bounds = array<i64: 128, 128>}, {transform_indices = @transform_4, window_bounds = array<i64: 1, 128>}, {transform_indices = @transform_5, window_bounds = array<i64: 8, 128>}]} {
    %c0 = arith.constant 0 : index
    %c0_0 = arith.constant 0 : index
    %0 = vector.load %arg3[%c0, %c0_0] : memref<128x128xbf16, #tpu.memory_space<vmem>>, vector<128x128xbf16>
    %1 = arith.extf %0 : vector<128x128xbf16> to vector<128x128xf32>
    %c0_1 = arith.constant 0 : index
    %c0_2 = arith.constant 0 : index
    %2 = vector.load %arg4[%c0_1, %c0_2] : memref<128x128xbf16, #tpu.memory_space<vmem>>, vector<128x128xbf16>
    %3 = arith.extf %2 : vector<128x128xbf16> to vector<128x128xf32>
    %c0_3 = arith.constant 0 : index
    %c0_4 = arith.constant 0 : index
    %4 = vector.load %arg5[%c0_3, %c0_4] : memref<128x128xbf16, #tpu.memory_space<vmem>>, vector<128x128xbf16>
    %5 = arith.extf %4 : vector<128x128xbf16> to vector<128x128xf32>
    %6 = arith.mulf %3, %5 : vector<128x128xf32>
    %7 = arith.addf %1, %6 : vector<128x128xf32>
    %8 = arith.truncf %7 : vector<128x128xf32> to vector<128x128xbf16>
    %c0_5 = arith.constant 0 : index
    %c0_6 = arith.constant 0 : index
    %9 = vector.load %arg2[%c0_5, %c0_6] : memref<8x128xf32, #tpu.memory_space<vmem>>, vector<8x128xf32>
    %10 = arith.truncf %9 : vector<8x128xf32> to vector<8x128xbf16>
    %cst = arith.constant dense<0.000000e+00> : vector<8x128xf32>
    %11 = tpu.matmul %10, %8, %cst {dimension_numbers = #tpu.dot_dimension_numbers<[1], [0], [0], [1], [0, 0, 1, 1], [], []>} : vector<8x128xbf16>, vector<128x128xbf16>, vector<8x128xf32> -> vector<8x128xf32>
    %c0_7 = arith.constant 0 : index
    %c0_8 = arith.constant 0 : index
    %12 = vector.load %arg6[%c0_7, %c0_8] : memref<1x128xf32, #tpu.memory_space<vmem>>, vector<1x128xf32>
    %13 = vector.broadcast %12 : vector<1x128xf32> to vector<8x128xf32>
    %14 = arith.addf %11, %13 : vector<8x128xf32>
    %c0_9 = arith.constant 0 : index
    %c0_10 = arith.constant 0 : index
    %15 = vector.load %arg7[%c0_9, %c0_10] : memref<8x128xf32, #tpu.memory_space<vmem>>, vector<8x128xf32>
    tpu.vector_store %arg7[%c0_9, %c0_10], %14 {strides = array<i32>} : memref<8x128xf32, #tpu.memory_space<vmem>>, vector<8x128xf32>,
    return
  }
  func.func @transform_0(%arg0: i32, %arg1: i32) -> (i32, i32) {
    %c0_i32 = arith.constant 0 : i32
    %c0_i32_0 = arith.constant 0 : i32
    return %arg0, %c0_i32 : i32, i32
  }
  func.func @transform_1(%arg0: i32, %arg1: i32) -> (i32, i32) {
    %c0_i32 = arith.constant 0 : i32
    %c0_i32_0 = arith.constant 0 : i32
    return %c0_i32, %arg1 : i32, i32
  }
  func.func @transform_2(%arg0: i32, %arg1: i32) -> (i32, i32) {
    %c0_i32 = arith.constant 0 : i32
    %c0_i32_0 = arith.constant 0 : i32
    return %c0_i32, %arg1 : i32, i32
  }
  func.func @transform_3(%arg0: i32, %arg1: i32) -> (i32, i32) {
    %c0_i32 = arith.constant 0 : i32
    %c0_i32_0 = arith.constant 0 : i32
    return %c0_i32, %arg1 : i32, i32
  }
  func.func @transform_4(%arg0: i32, %arg1: i32) -> (i32, i32) {
    %c0_i32 = arith.constant 0 : i32
    %c0_i32_0 = arith.constant 0 : i32
    return %c0_i32, %arg1 : i32, i32
  }
  func.func @transform_5(%arg0: i32, %arg1: i32) -> (i32, i32) {
    %c0_i32 = arith.constant 0 : i32
    return %arg0, %arg1 : i32, i32
  }
}

</mosaic_0001>

<bundles_post_ra>
// kernel: tpu_custom_call.1
= control target key start
LH: loop header
LB: loop body
LE: loop exit
PB: predicated region body
PF: predicated region fallthrough
CT: control target
= control target key end

     0   :  { %10 = vsyncpa [#allocation3], 0  ;;  %s672_s0 = inlined_call_operand.hbm [shape: f32[8,128], index: 0, kind: input, shape index: {}]   ;;  %s673_s1 = inlined_call_operand.hbm [shape: bf16[128,128], index: 1, kind: input, shape index: {}]   ;;  %s674_s2 = inlined_call_operand.hbm [shape: bf16[128,128], index: 2, kind: input, shape index: {}]   ;;  %s675_s3 = inlined_call_operand.hbm [shape: bf16[128,128], index: 3, kind: input, shape index: {}]   ;;  %s676_s4 = inlined_call_operand.vmem [shape: f32[1,128], index: 4, kind: input, shape index: {}]   ;;  %s677_s5 = inlined_call_operand.hbm [shape: f32[8,128], index: 5, kind: output, shape index: {}]  }
   0x1   :  { %11 = vsyncpa [#allocation6], 0 }
   0x2   :  { %12 = vsyncpa [#allocation9], 0 }
   0x3   :  { %13 = vsyncpa [#allocation4], 0  ;;  %s552_s18 = smov [#allocation5]   ;;  %s434_s22 = scalar_lea.hbm %s673_s1, 1024 }
   0x4   :  { %s29_s19 = sshll.u32 %s552_s18, 4  ;;  %p435_p0 = scmp.ne.s32.totalorder %s673_s1, %s434_s22  ;;  %s30_s19 = int_to_ptr.vmem [resolvable:$true] %s29_s19 }
   0x5   :  { %p438_p1 = scmp.lt.u32.totalorder %s434_s22, %s673_s1 }
   0x7   :  { %p440_p2 = pnand %p438_p1, %p435_p0 }
   0x9   :  { %443 = shalt.err (!%p440_p2)
}
   0xa   :  { %s444_s27 = scalar_lea.vmem %s30_s19, 1024  ;;  %p449_p4 = scmp.lt.s32.totalorder %s30_s19, %s30_s19 }
   0xb   :  { %p445_p3 = scmp.ne.s32.totalorder %s30_s19, %s444_s27  ;;  %p450_p5 = scmp.lt.s32.totalorder %s444_s27, %s444_s27 }
   0xd   :  { %p451_p6 = por %p450_p5, %p449_p4 }
   0xf   :  { %p452_p7 = pnand %p451_p6, %p445_p3 }
  0x11   :  { %455 = shalt.err (!%p452_p7)
}
  0x12   :  { %s553_s28 = smov 64   ;;  %s554_s29 = smov 4  }
  0x13   :  { %35 = dma.hbm_to_vmem [thread:$0]  %s673_s1, 1024, %s30_s19, [#allocation6], %s553_s28, %s553_s28, %s554_s29  }
  0x14   :  { %s555_s7 = smov [#allocation2]   ;;  %s556_s9 = smov [#allocation7]  }
  0x15   :  { %s20_s8 = sshll.u32 %s555_s7, 4  ;;  %s41_s10 = sshll.u32 %s556_s9, 4  ;;  %s21_s8 = int_to_ptr.vmem [resolvable:$true] %s20_s8  ;;  %s42_s10 = int_to_ptr.vmem [resolvable:$true] %s41_s10 }
  0x16   :  { %s456_s13 = scalar_lea.hbm %s672_s0, 128 }
  0x17   :  { %p457_p8 = scmp.ne.s32.totalorder %s672_s0, %s456_s13  ;;  %p460_p9 = scmp.lt.u32.totalorder %s456_s13, %s672_s0 }
  0x19   :  { %p462_p10 = pnand %p460_p9, %p457_p8 }
  0x1b   :  { %465 = shalt.err (!%p462_p10)
}
  0x1c   :  { %s466_s1 = scalar_lea.vmem %s21_s8, 128  ;;  %p471_p12 = scmp.lt.s32.totalorder %s21_s8, %s21_s8 }
  0x1d   :  { %p467_p11 = scmp.ne.s32.totalorder %s21_s8, %s466_s1  ;;  %p472_p13 = scmp.lt.s32.totalorder %s466_s1, %s466_s1 }
  0x1f   :  { %p473_p0 = por %p472_p13, %p471_p12 }
  0x21   :  { %p474_p1 = pnand %p473_p0, %p467_p11 }
  0x23   :  { %477 = shalt.err (!%p474_p1)
}
  0x24   :  { %23 = dma.hbm_to_vmem [thread:$0]  %s672_s0, 128, %s21_s8, [#allocation3]  }
  0x25   :  { %s478_s22 = scalar_lea.hbm %s674_s2, 1024 }
  0x26   :  { %p479_p2 = scmp.ne.s32.totalorder %s674_s2, %s478_s22  ;;  %p482_p3 = scmp.lt.u32.totalorder %s478_s22, %s674_s2 }
  0x28   :  { %p484_p4 = pnand %p482_p3, %p479_p2 }
  0x2a   :  { %487 = shalt.err (!%p484_p4)
}
  0x2b   :  { %s488_s27 = scalar_lea.vmem %s42_s10, 1024  ;;  %p493_p6 = scmp.lt.s32.totalorder %s42_s10, %s42_s10 }
  0x2c   :  { %p489_p5 = scmp.ne.s32.totalorder %s42_s10, %s488_s27  ;;  %p494_p7 = scmp.lt.s32.totalorder %s488_s27, %s488_s27 }
  0x2e   :  { %p495_p8 = por %p494_p7, %p493_p6 }
  0x30   :  { %p496_p9 = pnand %p495_p8, %p489_p5 }
  0x32   :  { %499 = shalt.err (!%p496_p9)
}
  0x33   :  { %47 = dma.hbm_to_vmem [thread:$0]  %s674_s2, 1024, %s42_s10, [#allocation6], %s553_s28, %s553_s28, %s554_s29  }
  0x34   :  { %s557_s6 = smov [#allocation8]   ;;  %s500_s11 = scalar_lea.hbm %s675_s3, 1024 }
  0x35   :  { %s53_s7 = sshll.u32 %s557_s6, 4  ;;  %p501_p10 = scmp.ne.s32.totalorder %s675_s3, %s500_s11  ;;  %s54_s7 = int_to_ptr.vmem [resolvable:$true] %s53_s7 }
  0x36   :  { %p504_p11 = scmp.lt.u32.totalorder %s500_s11, %s675_s3 }
  0x38   :  { %p506_p12 = pnand %p504_p11, %p501_p10 }
  0x3a   :  { %509 = shalt.err (!%p506_p12)
}
  0x3b   :  { %s510_s16 = scalar_lea.vmem %s54_s7, 1024  ;;  %p515_p0 = scmp.lt.s32.totalorder %s54_s7, %s54_s7 }
  0x3c   :  { %p511_p13 = scmp.ne.s32.totalorder %s54_s7, %s510_s16  ;;  %p516_p1 = scmp.lt.s32.totalorder %s510_s16, %s510_s16 }
  0x3e   :  { %p517_p2 = por %p516_p1, %p515_p0 }
  0x40   :  { %p518_p3 = pnand %p517_p2, %p511_p13 }
  0x42   :  { %521 = shalt.err (!%p518_p3)
}
  0x43   :  { %59 = dma.hbm_to_vmem [thread:$0]  %s675_s3, 1024, %s54_s7, [#allocation9], %s553_s28, %s553_s28, %s554_s29  }
  0x44   :  { %544 = dma.done.wait [#allocation3], 128  }
  0x45   :  { %545 = vsyncadd [#allocation3], 4294967168 }
  0x46   :  { %546 = dma.done.wait [#allocation6], 2048  }
  0x47   :  { %547 = vsyncadd [#allocation6], 4294965248 }
  0x48   :  { %548 = dma.done.wait [#allocation9], 1024  }
  0x49   :  { %549 = vsyncadd [#allocation9], 4294966272  ;;  %v558_v0 = vmov 0.0   ;;  %vm559_vm0 = vmmov 0   ;;  %v280_v1 = vld [vmem:[#allocation5] sm:$0xff]   ;;  %v375_v8 = vld [vmem:[#allocation5 + $0x8] sm:$0xff]  }
  0x4a   :  { %405 = vmatprep.subr.bf16.mxu0 %v558_v0  ;;  %421 = vmatprep.mubr.msk.bf16.mxu0 %vm559_vm0, %v558_v0  ;;  %v312_v2 = vld [vmem:[#allocation7] sm:$0xff]   ;;  %v281_v4 = vunpack.c.l.bf16 %v280_v1  ;;  %v282_v5 = vunpack.c.h.bf16 %v280_v1  ;;  %v382_v9 = vld [vmem:[#allocation7 + $0x8] sm:$0xff]   ;;  %v285_v13 = vunpack.c.l.bf16 %v375_v8  ;;  %v286_v14 = vunpack.c.h.bf16 %v375_v8  ;;  %v376_v15 = vld [vmem:[#allocation5 + $0x10] sm:$0xff]   ;;  %s560_s29 = smov [#allocation10]  }
  0x4b   :  { %v344_v3 = vld [vmem:[#allocation8] sm:$0xff]   ;;  %v313_v6 = vunpack.c.l.bf16 %v312_v2  ;;  %v314_v7 = vunpack.c.h.bf16 %v312_v2  ;;  %v389_v10 = vld [vmem:[#allocation8 + $0x8] sm:$0xff]   ;;  %v383_v16 = vld [vmem:[#allocation7 + $0x10] sm:$0xff]   ;;  %v317_v17 = vunpack.c.l.bf16 %v382_v9  ;;  %v318_v18 = vunpack.c.h.bf16 %v382_v9  ;;  %s267_s17 = sshll.u32 %s560_s29, 4  ;;  %s268_s17 = int_to_ptr.vmem [resolvable:$true] %s267_s17 }
  0x4c   :  { %v345_v11 = vunpack.c.l.bf16 %v344_v3  ;;  %v346_v12 = vunpack.c.h.bf16 %v344_v3  ;;  %v349_v19 = vunpack.c.l.bf16 %v389_v10  ;;  %v350_v20 = vunpack.c.h.bf16 %v389_v10  ;;  %v390_v21 = vld [vmem:[#allocation8 + $0x10] sm:$0xff]   ;;  %v377_v26 = vld [vmem:[#allocation5 + $0x18] sm:$0xff]   ;;  %v385_v44 = vld [vmem:[#allocation7 + $0x20] sm:$0xff]   ;;  %s522_s1 = scalar_lea.vmem %s268_s17, 128  ;;  %p527_p5 = scmp.lt.s32.totalorder %s268_s17, %s268_s17 }
  0x4d   :  { %v289_v24 = vunpack.c.l.bf16 %v376_v15  ;;  %v290_v25 = vunpack.c.h.bf16 %v376_v15  ;;  %v321_v29 = vunpack.c.l.bf16 %v383_v16  ;;  %v322_v30 = vunpack.c.h.bf16 %v383_v16  ;;  %v384_v31 = vld [vmem:[#allocation7 + $0x18] sm:$0xff]   ;;  %v378_v49 = vld [vmem:[#allocation5 + $0x20] sm:$0xff]   ;;  %v386_v54 = vld [vmem:[#allocation7 + $0x28] sm:$0xff]   ;;  %p523_p4 = scmp.ne.s32.totalorder %s268_s17, %s522_s1  ;;  %p528_p6 = scmp.lt.s32.totalorder %s522_s1, %s522_s1 }
  0x4e   :  { %v171_v22 = vmul.f32 %v345_v11, %v313_v6  ;;  %v172_v23 = vmul.f32 %v346_v12, %v314_v7  ;;  %v173_v27 = vmul.f32 %v349_v19, %v317_v17  ;;  %v174_v28 = vmul.f32 %v350_v20, %v318_v18  ;;  %v391_v36 = vld [vmem:[#allocation8 + $0x18] sm:$0xff]   ;;  %v392_v50 = vld [vmem:[#allocation8 + $0x20] sm:$0xff]   ;;  %v393_v59 = vld [vmem:[#allocation8 + $0x28] sm:$0xff]  }
  0x4f   :  { %v353_v34 = vunpack.c.l.bf16 %v390_v21  ;;  %v354_v35 = vunpack.c.h.bf16 %v390_v21  ;;  %v293_v39 = vunpack.c.l.bf16 %v377_v26  ;;  %v325_v43 = vunpack.c.l.bf16 %v384_v31  ;;  %v379_v1 = vld [vmem:[#allocation5 + $0x28] sm:$0xff]   ;;  %v387_v6 = vld [vmem:[#allocation7 + $0x30] sm:$0xff]   ;;  %p529_p7 = por %p528_p6, %p527_p5 }
  0x50   :  { %v187_v32 = vadd.f32 %v281_v4, %v171_v22  ;;  %v188_v33 = vadd.f32 %v282_v5, %v172_v23  ;;  %v189_v37 = vadd.f32 %v285_v13, %v173_v27  ;;  %v190_v38 = vadd.f32 %v286_v14, %v174_v28  ;;  %v394_v11 = vld [vmem:[#allocation8 + $0x30] sm:$0xff]  }
  0x51   :  { %v175_v41 = vmul.f32 %v353_v34, %v321_v29  ;;  %v176_v42 = vmul.f32 %v354_v35, %v322_v30  ;;  %v294_v45 = vunpack.c.h.bf16 %v377_v26  ;;  %v326_v46 = vunpack.c.h.bf16 %v384_v31  ;;  %v380_v20 = vld [vmem:[#allocation5 + $0x30] sm:$0xff]   ;;  %v395_v26 = vld [vmem:[#allocation8 + $0x38] sm:$0xff]   ;;  %p530_p8 = pnand %p529_p7, %p523_p4 }
  0x52   :  { %v203_v40 = vpack.c.bf16 %v188_v33, %v187_v32  ;;  %v357_v47 = vunpack.c.l.bf16 %v391_v36  ;;  %v358_v48 = vunpack.c.h.bf16 %v391_v36  ;;  %v204_v51 = vpack.c.bf16 %v190_v38, %v189_v37  ;;  %v381_v34 = vld [vmem:[#allocation5 + $0x38] sm:$0xff]  }
  0x53   :  { %v191_v52 = vadd.f32 %v289_v24, %v175_v41  ;;  %v192_v53 = vadd.f32 %v290_v25, %v176_v42  ;;  %v329_v57 = vunpack.c.l.bf16 %v385_v44  ;;  %v330_v58 = vunpack.c.h.bf16 %v385_v44  ;;  %v388_v25 = vld [vmem:[#allocation7 + $0x38] sm:$0xff]  }
  0x54   :  { %406 = vmatpush3.bf16.msra.mxu0 %v203_v40  ;;  %v177_v55 = vmul.f32 %v357_v47, %v325_v43  ;;  %v178_v56 = vmul.f32 %v358_v48, %v326_v46  ;;  %v297_v60 = vunpack.c.l.bf16 %v378_v49  ;;  %v298_v61 = vunpack.c.h.bf16 %v378_v49 }
  0x55   :  { %407 = vmatprep.subr.bf16.mxu0 %v558_v0  ;;  %v361_v62 = vunpack.c.l.bf16 %v392_v50  ;;  %v362_v63 = vunpack.c.h.bf16 %v392_v50  ;;  %v205_v2 = vpack.c.bf16 %v192_v53, %v191_v52  ;;  %v333_v5 = vunpack.c.l.bf16 %v386_v54  ;;  %v211_v50 = vld [vmem:[#allocation2] sm:$0xff] }
  0x56   :  { %v193_v3 = vadd.f32 %v293_v39, %v177_v55  ;;  %v194_v4 = vadd.f32 %v294_v45, %v178_v56  ;;  %v334_v9 = vunpack.c.h.bf16 %v386_v54  ;;  %v365_v10 = vunpack.c.l.bf16 %v393_v59  ;;  %v278_v52 = vld [vmem:[%s676_s4] ss:$0 sm:$0xff] }
  0x57   :  { %v179_v7 = vmul.f32 %v361_v62, %v329_v57  ;;  %v180_v8 = vmul.f32 %v362_v63, %v330_v58  ;;  %v301_v12 = vunpack.c.l.bf16 %v379_v1  ;;  %v302_v13 = vunpack.c.h.bf16 %v379_v1 }
  0x58   :  { %408 = vmatpush3.bf16.msra.mxu0 %v204_v51  ;;  %v366_v14 = vunpack.c.h.bf16 %v393_v59  ;;  %v181_v17 = vmul.f32 %v365_v10, %v333_v5  ;;  %v337_v18 = vunpack.c.l.bf16 %v387_v6  ;;  %v338_v21 = vunpack.c.h.bf16 %v387_v6 }
  0x59   :  { %409 = vmatprep.subr.bf16.mxu0 %v558_v0  ;;  %v195_v15 = vadd.f32 %v297_v60, %v179_v7  ;;  %v196_v16 = vadd.f32 %v298_v61, %v180_v8  ;;  %v369_v22 = vunpack.c.l.bf16 %v394_v11  ;;  %v370_v23 = vunpack.c.h.bf16 %v394_v11 }
  0x5a   :  { %v182_v19 = vmul.f32 %v366_v14, %v334_v9  ;;  %v206_v24 = vpack.c.bf16 %v194_v4, %v193_v3  ;;  %v305_v28 = vunpack.c.l.bf16 %v380_v20  ;;  %v306_v29 = vunpack.c.h.bf16 %v380_v20 }
  0x5b   :  { %v207_v27 = vpack.c.bf16 %v196_v16, %v195_v15  ;;  %v197_v30 = vadd.f32 %v301_v12, %v181_v17  ;;  %v183_v32 = vmul.f32 %v369_v22, %v337_v18  ;;  %v184_v33 = vmul.f32 %v370_v23, %v338_v21 }
  0x5c   :  { %410 = vmatpush3.bf16.msra.mxu0 %v205_v2  ;;  %v198_v31 = vadd.f32 %v302_v13, %v182_v19  ;;  %v341_v35 = vunpack.c.l.bf16 %v388_v25  ;;  %v342_v36 = vunpack.c.h.bf16 %v388_v25  ;;  %v373_v37 = vunpack.c.l.bf16 %v395_v26 }
  0x5d   :  { %411 = vmatprep.subr.bf16.mxu0 %v558_v0  ;;  %v374_v38 = vunpack.c.h.bf16 %v395_v26  ;;  %v309_v40 = vunpack.c.l.bf16 %v381_v34  ;;  %v310_v41 = vunpack.c.h.bf16 %v381_v34  ;;  %v199_v42 = vadd.f32 %v305_v28, %v183_v32 }
  0x5e   :  { %v208_v39 = vpack.c.bf16 %v198_v31, %v197_v30  ;;  %v200_v43 = vadd.f32 %v306_v29, %v184_v33  ;;  %v185_v44 = vmul.f32 %v373_v37, %v341_v35  ;;  %v212_v51 = vpack.c.bf16 %v211_v50, %v211_v50 }
  0x5f   :  { %v186_v45 = vmul.f32 %v374_v38, %v342_v36 }
  0x60   :  { %412 = vmatpush3.bf16.msra.mxu0 %v206_v24  ;;  %v209_v46 = vpack.c.bf16 %v200_v43, %v199_v42  ;;  %v201_v47 = vadd.f32 %v309_v40, %v185_v44 }
  0x61   :  { %413 = vmatprep.subr.bf16.mxu0 %v558_v0  ;;  %v202_v48 = vadd.f32 %v310_v41, %v186_v45 }
  0x63   :  { %v210_v49 = vpack.c.bf16 %v202_v48, %v201_v47 }
  0x64   :  { %414 = vmatpush3.bf16.msra.mxu0 %v207_v27 }
  0x65   :  { %415 = vmatprep.subr.bf16.mxu0 %v558_v0 }
  0x68   :  { %416 = vmatpush3.bf16.msra.mxu0 %v208_v39 }
  0x69   :  { %417 = vmatprep.subr.bf16.mxu0 %v558_v0 }
  0x6c   :  { %418 = vmatpush3.bf16.msra.mxu0 %v209_v46 }
  0x6d   :  { %419 = vmatprep.subr.bf16.mxu0 %v558_v0 }
  0x70   :  { %420 = vmatpush3.bf16.msra.mxu0 %v210_v49 }
  0x73   :  { %422 = vmatmul.mubr.bf16.vlgmr.msra.gmra.mrb[0].mxu0 %v212_v51 }
 0x146   :  { %v254_v53 = vpop.f32.mrb[0].mxu0 }
 0x147   :  { %v255_v54 = vadd.f32 %v278_v52, %v254_v53  ;;  %v423_v55 = vpop.f32.mrb[1].mxu0 }
 0x148   :  { %v257_v56 = vpop.f32.mrb[2].mxu0 }
 0x149   :  { %260 = vst [vmem:[#allocation10] sm:$0xff] %v255_v54  ;;  %v424_v57 = vpop.f32.mrb[3].mxu0 }
 0x14a   :  { %533 = shalt.err (!%p530_p8)
}
 0x14b   :  { %s534_s4 = scalar_lea.hbm %s677_s5, 128 }
 0x14c   :  { %p535_p9 = scmp.ne.s32.totalorder %s677_s5, %s534_s4  ;;  %p538_p10 = scmp.lt.u32.totalorder %s534_s4, %s677_s5 }
 0x14e   :  { %p540_p11 = pnand %p538_p10, %p535_p9 }
 0x150   :  { %543 = shalt.err (!%p540_p11)
}
 0x151   :  { %270 = dma.vmem_to_hbm [thread:$0]  %s268_s17, 128, %s677_s5, [#allocation4]  }
 0x152   :  { %550 = dma.done.wait [#allocation4], 128  }
 0x153   :  { %551 = vsyncadd [#allocation4], 4294967168 }
 0x154   :  { %274 = vsyncpa [#allocation3], 1 }
 0x155   :  { %275 = vsyncpa [#allocation6], 1 }
 0x156   :  { %276 = vsyncpa [#allocation9], 1 }
 0x157   :  { %277 = vsyncpa [#allocation4], 1 }

</bundles_post_ra>
